<compile_context>
chip_gen: v7x
topology: tpu7x:2x2x1
jax: 0.10.0
libtpu: 0.0.40
codegen_flags: <defaults>
</compile_context>

<pallas_src>
import functools

import jax
import jax.numpy as jnp
from jax.experimental import pallas as pl
from jax.experimental.pallas import tpu as pltpu

ALPHA = 0.25
GAMMA = 2.0
LANES = 128


def _focal_loss_kernel(p_ref, t_ref, o_ref, *, alpha, gamma, tm, full_rows, rem):
    c = pl.program_id(0)            # core-split axis (parallel / core_parallel)
    j = pl.program_id(1)            # reduction axis  (arbitrary)
    steps = pl.num_programs(1)

    @pl.when(j == 0)
    def _():
        o_ref[...] = jnp.zeros_like(o_ref)

    x = p_ref[...].astype(jnp.float32)   # (tm, 128) raw logits, native dtype in HBM
    t = t_ref[...].astype(jnp.float32)   # (tm, 128) targets in [0, 1]

    # log(sigmoid(x)) = min(x,0) - log1p(exp(-|x|)); log(1-sigmoid(x)) = log(sigmoid(x)) - x.
    e = jnp.exp(-jnp.abs(x))                           # EUP: exp
    log_p_raw = jnp.minimum(x, 0.0) - jnp.log1p(e)     # EUP: log1p
    log_1mp_raw = log_p_raw - x

    # PyTorch binary_cross_entropy clamps the log terms at -100.
    log_p = jnp.maximum(log_p_raw, -100.0)
    log_1mp = jnp.maximum(log_1mp_raw, -100.0)
    bce = -(t * log_p + (1.0 - t) * log_1mp)

    # p = sigmoid(x) rebuilt from the already-computed e (no third transcendental).
    p = jnp.where(x >= 0.0, 1.0, e) * pl.reciprocal(1.0 + e)   # exact reciprocal

    alpha_factor = (1.0 - alpha) + (2.0 * alpha - 1.0) * t     # == a*t + (1-a)*(1-t)
    one_minus_pt = p + t - 2.0 * (p * t)                       # == 1 - (p*t + (1-p)*(1-t))
    if gamma == 2.0:
        gpow = one_minus_pt * one_minus_pt                     # VPU only
    elif float(gamma).is_integer():
        gpow = jax.lax.integer_pow(one_minus_pt, int(gamma))
    else:
        gpow = jnp.power(one_minus_pt, gamma)

    loss = bce * (alpha_factor * gpow)                         # (tm, 128)

    block_row0 = (c * steps + j) * tm       # first global row this block claims
    needs_mask = block_row0 + tm > full_rows

    def _fold(v):
        # (tm,128) -> (8,128): elementwise vreg adds only, no cross-sublane XLU.
        return jnp.sum(v.reshape(tm // 8, 8, LANES), axis=0)

    @pl.when(jnp.logical_not(needs_mask))
    def _():
        o_ref[...] += _fold(loss)[None]

    @pl.when(needs_mask)
    def _():
        # Covers: partially valid trailing blocks, pad rows, and clamped
        # (re-read) blocks on a split with no remaining work.
        g_rows = jax.lax.broadcasted_iota(jnp.int32, (tm, LANES), 0) + block_row0
        if rem == 0:
            mask = g_rows < full_rows
        else:
            lanes = jax.lax.broadcasted_iota(jnp.int32, (tm, LANES), 1)
            mask = (g_rows < full_rows) | ((g_rows == full_rows) & (lanes < rem))
        o_ref[...] += _fold(jnp.where(mask, loss, 0.0))[None]


def _round_up(x, m):
    return ((x + m - 1) // m) * m


def _canon(a):
    # Keep 16/32-bit floats native (stream fewer HBM bytes); widen everything else.
    if a.dtype in (jnp.float32, jnp.bfloat16, jnp.float16):
        return a
    return a.astype(jnp.float32)


def _num_tensorcores():
    try:
        kind = jax.devices()[0].device_kind.lower()
    except Exception:
        return 1
    return 2 if ("v7" in kind or "7x" in kind) else 1


@functools.partial(jax.jit, static_argnames=("alpha", "gamma", "tm", "n_split"))
def focal_loss(preds, targets, *, alpha=ALPHA, gamma=GAMMA, tm=4096, n_split=None):
    """Mean focal loss over all elements. `preds` are raw logits, any shape."""
    assert preds.shape == targets.shape
    assert tm % 8 == 0

    n_tc = _num_tensorcores()
    if n_split is None:
        n_split = n_tc

    preds = _canon(preds)
    targets = _canon(targets)

    n_total = preds.size
    rows = pl.cdiv(n_total, LANES)
    full_rows = n_total // LANES
    rem = n_total % LANES

    # Min sublane multiple for the narrowest streamed dtype (f32: 8, 16-bit: 16).
    sub = max({4: 8, 2: 16}.get(preds.dtype.itemsize, 8),
              {4: 8, 2: 16}.get(targets.dtype.itemsize, 8))

    per_split = pl.cdiv(rows, n_split)
    tm_cap = max(sub, (rows // sub) * sub)              # biggest sub-multiple <= rows
    tm_eff = min(tm, _round_up(per_split, sub), tm_cap)

    # Zero-copy path: a flat multiple of 128 reshapes (bitcast) straight into the
    # (rows, 128) slab -- no padded HBM copy.  Only a <128-element tail pads.
    if rem == 0:
        p2 = preds.reshape(rows, LANES)
        t2 = targets.reshape(rows, LANES)
    else:
        rows_alloc = _round_up(rows, sub)
        pad = rows_alloc * LANES - n_total
        p2 = jnp.pad(preds.reshape(-1), (0, pad)).reshape(rows_alloc, LANES)
        t2 = jnp.pad(targets.reshape(-1), (0, pad)).reshape(rows_alloc, LANES)

    nb = pl.cdiv(rows, tm_eff)        # blocks that actually contain data
    steps = pl.cdiv(nb, n_split)      # reduction steps per core-split

    kernel = functools.partial(
        _focal_loss_kernel, alpha=float(alpha), gamma=float(gamma),
        tm=tm_eff, full_rows=full_rows, rem=rem,
    )

    def in_index(c, j):
        # Clamp so a split's trailing (empty) iterations just re-read the last
        # real block; the kernel masks their contribution to zero.
        return (jnp.minimum(c * steps + j, nb - 1), 0)

    if n_split > 1 and n_tc > 1:
        dims = (pltpu.CORE_PARALLEL, pltpu.ARBITRARY)   # real 2-TC sharding (v7x)
    elif n_split > 1:
        dims = ("parallel", "arbitrary")
    else:
        dims = ("arbitrary", "arbitrary")

    out = pl.pallas_call(
        kernel,
        out_shape=jax.ShapeDtypeStruct((n_split, 8, LANES), jnp.float32),
        grid_spec=pltpu.PrefetchScalarGridSpec(
            num_scalar_prefetch=0,
            grid=(n_split, steps),
            in_specs=[
                pl.BlockSpec((tm_eff, LANES), in_index),
                pl.BlockSpec((tm_eff, LANES), in_index),
            ],
            out_specs=pl.BlockSpec((1, 8, LANES), lambda c, j: (c, 0, 0)),
        ),
        compiler_params=pltpu.CompilerParams(
            dimension_semantics=dims,
            vmem_limit_bytes=32 * 1024 * 1024,
        ),
    )(p2, t2)

    return jnp.sum(out) / n_total


def focal_loss_ref(preds, targets, alpha=ALPHA, gamma=GAMMA):
    # Faithful to the PyTorch module: sigmoid + BCE(reduction='none') with the
    # -100 log clamp, focal weighting, mean.
    # TODO(synk): the module's logger warnings for out-of-range preds/targets are
    # side-effect logging with no Pallas equivalent; omitted.
    p = jax.nn.sigmoid(preds.astype(jnp.float32))
    t = targets.astype(jnp.float32)
    bce = -(t * jnp.maximum(jnp.log(p), -100.0)
            + (1.0 - t) * jnp.maximum(jnp.log(1.0 - p), -100.0))
    alpha_factor = alpha * t + (1.0 - alpha) * (1.0 - t)
    pt = p * t + (1.0 - p) * (1.0 - t)
    focal_weight = alpha_factor * (1.0 - pt) ** gamma
    return jnp.mean(bce * focal_weight)


if __name__ == "__main__":
    key = jax.random.PRNGKey(0)
    k1, k2, k3, k4 = jax.random.split(key, 4)

    # NCHW logits and binary targets, matching the PyTorch module's usage.
    preds = jax.random.normal(k1, (2, 4, 16, 16), dtype=jnp.float32)
    targets = (jax.random.uniform(k2, (2, 4, 16, 16)) > 0.5).astype(jnp.float32)
    loss = jax.block_until_ready(focal_loss(preds, targets))
    ref = focal_loss_ref(preds, targets)
    assert jnp.allclose(loss, ref, rtol=1e-5, atol=1e-6), (loss, ref)

    # Ragged size (not a multiple of 128): exercises the masked tail path.
    preds2 = jax.random.normal(k3, (3, 5, 7, 11), dtype=jnp.float32)
    targets2 = (jax.random.uniform(k4, (3, 5, 7, 11)) > 0.5).astype(jnp.float32)
    loss2 = jax.block_until_ready(focal_loss(preds2, targets2))
    ref2 = focal_loss_ref(preds2, targets2)
    assert jnp.allclose(loss2, ref2, rtol=1e-5, atol=1e-6), (loss2, ref2)

    print("KERNEL_OK")
</pallas_src>

<mosaic_0001>
module attributes {stable_mosaic.version = 11 : i64} {
  func.func @_focal_loss_kernel(%arg0: i32, %arg1: i32, %arg2: memref<16x128xf32, #tpu.memory_space<vmem>>, %arg3: memref<16x128xf32, #tpu.memory_space<vmem>>, %arg4: memref<1x8x128xf32, #tpu.memory_space<vmem>>) attributes {dimension_semantics = [#tpu.dimension_semantics<arbitrary>, #tpu.dimension_semantics<arbitrary>], iteration_bounds = array<i64: 1, 1>, scalar_prefetch = 0 : i64, scratch_operands = 0 : i64, tpu.core_type = #tpu.core_type<tc>, window_params = [{transform_indices = @transform_0, window_bounds = array<i64: 16, 128>}, {transform_indices = @transform_1, window_bounds = array<i64: 16, 128>}, {transform_indices = @transform_2, window_bounds = array<i64: 1, 8, 128>}]} {
    %c0_i32 = arith.constant 0 : i32
    %0 = arith.cmpi eq, %arg1, %c0_i32 : i32
    %1 = arith.extui %0 : i1 to i32
    %c0_i32_0 = arith.constant 0 : i32
    %2 = arith.cmpi ne, %1, %c0_i32_0 : i32
    scf.if %2 {
      %cst_19 = arith.constant 0.000000e+00 : f32
      %55 = vector.broadcast %cst_19 : f32 to vector<1x8x128xf32>
      %c0_20 = arith.constant 0 : index
      %c0_21 = arith.constant 0 : index
      %c0_22 = arith.constant 0 : index
      %56 = vector.load %arg4[%c0_20, %c0_21, %c0_22] : memref<1x8x128xf32, #tpu.memory_space<vmem>>, vector<1x8x128xf32>
      tpu.vector_store %arg4[%c0_20, %c0_21, %c0_22], %55 {strides = array<i32>} : memref<1x8x128xf32, #tpu.memory_space<vmem>>, vector<1x8x128xf32>,
    } else {
    }
    %c0 = arith.constant 0 : index
    %c0_1 = arith.constant 0 : index
    %3 = vector.load %arg2[%c0, %c0_1] : memref<16x128xf32, #tpu.memory_space<vmem>>, vector<16x128xf32>
    %c0_2 = arith.constant 0 : index
    %c0_3 = arith.constant 0 : index
    %4 = vector.load %arg3[%c0_2, %c0_3] : memref<16x128xf32, #tpu.memory_space<vmem>>, vector<16x128xf32>
    %5 = math.absf %3 : vector<16x128xf32>
    %cst = arith.constant 0.000000e+00 : f32
    %6 = vector.broadcast %cst : f32 to vector<16x128xf32>
    %7 = arith.subf %6, %5 : vector<16x128xf32>
    %8 = math.exp %7 : vector<16x128xf32>
    %cst_4 = arith.constant 0.000000e+00 : f32
    %9 = vector.broadcast %cst_4 : f32 to vector<16x128xf32>
    %10 = arith.minimumf %3, %9 : vector<16x128xf32>
    %11 = math.log1p %8 : vector<16x128xf32>
    %12 = arith.subf %10, %11 : vector<16x128xf32>
    %13 = arith.subf %12, %3 : vector<16x128xf32>
    %cst_5 = arith.constant -1.000000e+02 : f32
    %14 = vector.broadcast %cst_5 : f32 to vector<16x128xf32>
    %15 = arith.maximumf %12, %14 : vector<16x128xf32>
    %cst_6 = arith.constant -1.000000e+02 : f32
    %16 = vector.broadcast %cst_6 : f32 to vector<16x128xf32>
    %17 = arith.maximumf %13, %16 : vector<16x128xf32>
    %18 = arith.mulf %4, %15 : vector<16x128xf32>
    %cst_7 = arith.constant 1.000000e+00 : f32
    %19 = vector.broadcast %cst_7 : f32 to vector<16x128xf32>
    %20 = arith.subf %19, %4 : vector<16x128xf32>
    %21 = arith.mulf %20, %17 : vector<16x128xf32>
    %22 = arith.addf %18, %21 : vector<16x128xf32>
    %cst_8 = arith.constant 0.000000e+00 : f32
    %23 = vector.broadcast %cst_8 : f32 to vector<16x128xf32>
    %24 = arith.subf %23, %22 : vector<16x128xf32>
    %cst_9 = arith.constant 0.000000e+00 : f32
    %25 = vector.broadcast %cst_9 : f32 to vector<16x128xf32>
    %26 = arith.cmpf oge, %3, %25 : vector<16x128xf32>
    %cst_10 = arith.constant 1.000000e+00 : f32
    %27 = vector.broadcast %cst_10 : f32 to vector<16x128xf32>
    %28 = arith.select %26, %27, %8 : vector<16x128xi1>, vector<16x128xf32>
    %cst_11 = arith.constant 1.000000e+00 : f32
    %29 = vector.broadcast %cst_11 : f32 to vector<16x128xf32>
    %30 = arith.addf %29, %8 : vector<16x128xf32>
    %31 = tpu.reciprocal %30 : vector<16x128xf32> -> vector<16x128xf32>
    %32 = arith.mulf %28, %31 : vector<16x128xf32>
    %cst_12 = arith.constant -5.000000e-01 : f32
    %33 = vector.broadcast %cst_12 : f32 to vector<16x128xf32>
    %34 = arith.mulf %33, %4 : vector<16x128xf32>
    %cst_13 = arith.constant 7.500000e-01 : f32
    %35 = vector.broadcast %cst_13 : f32 to vector<16x128xf32>
    %36 = arith.addf %35, %34 : vector<16x128xf32>
    %37 = arith.addf %32, %4 : vector<16x128xf32>
    %38 = arith.mulf %32, %4 : vector<16x128xf32>
    %cst_14 = arith.constant 2.000000e+00 : f32
    %39 = vector.broadcast %cst_14 : f32 to vector<16x128xf32>
    %40 = arith.mulf %39, %38 : vector<16x128xf32>
    %41 = arith.subf %37, %40 : vector<16x128xf32>
    %42 = arith.mulf %41, %41 : vector<16x128xf32>
    %43 = arith.mulf %36, %42 : vector<16x128xf32>
    %44 = arith.mulf %24, %43 : vector<16x128xf32>
    %c1_i32 = arith.constant 1 : i32
    %45 = arith.muli %arg0, %c1_i32 : i32
    %46 = arith.addi %45, %arg1 : i32
    %c16_i32 = arith.constant 16 : i32
    %47 = arith.muli %46, %c16_i32 : i32
    %c16_i32_15 = arith.constant 16 : i32
    %48 = arith.addi %47, %c16_i32_15 : i32
    %c16_i32_16 = arith.constant 16 : i32
    %49 = arith.cmpi sgt, %48, %c16_i32_16 : i32
    %true = arith.constant true
    %50 = arith.xori %49, %true : i1
    %51 = arith.extui %50 : i1 to i32
    %c0_i32_17 = arith.constant 0 : i32
    %52 = arith.cmpi ne, %51, %c0_i32_17 : i32
    scf.if %52 {
      %c0_19 = arith.constant 0 : index
      %c0_20 = arith.constant 0 : index
      %c0_21 = arith.constant 0 : index
      %55 = vector.load %arg4[%c0_19, %c0_20, %c0_21] : memref<1x8x128xf32, #tpu.memory_space<vmem>>, vector<1x8x128xf32>
      %56 = vector.shape_cast %44 : vector<16x128xf32> to vector<2x8x128xf32>
      %cst_22 = arith.constant dense<0.000000e+00> : vector<8x128xf32>
      %57 = vector.multi_reduction <add>, %56, %cst_22 [0] : vector<2x8x128xf32> to vector<8x128xf32>
      %58 = vector.shape_cast %57 : vector<8x128xf32> to vector<1x8x128xf32>
      %59 = arith.addf %55, %58 : vector<1x8x128xf32>
      %c0_23 = arith.constant 0 : index
      %c0_24 = arith.constant 0 : index
      %c0_25 = arith.constant 0 : index
      %60 = vector.load %arg4[%c0_23, %c0_24, %c0_25] : memref<1x8x128xf32, #tpu.memory_space<vmem>>, vector<1x8x128xf32>
      tpu.vector_store %arg4[%c0_23, %c0_24, %c0_25], %59 {strides = array<i32>} : memref<1x8x128xf32, #tpu.memory_space<vmem>>, vector<1x8x128xf32>,
    } else {
    }
    %53 = arith.extui %49 : i1 to i32
    %c0_i32_18 = arith.constant 0 : i32
    %54 = arith.cmpi ne, %53, %c0_i32_18 : i32
    scf.if %54 {
      %55 = tpu.iota {dimensions = array<i32: 0>} : vector<16x128xi32>
      %56 = vector.broadcast %47 : i32 to vector<16x128xi32>
      %57 = arith.addi %55, %56 : vector<16x128xi32>
      %c16_i32_19 = arith.constant 16 : i32
      %58 = vector.broadcast %c16_i32_19 : i32 to vector<16x128xi32>
      %59 = arith.cmpi slt, %57, %58 : vector<16x128xi32>
      %c0_20 = arith.constant 0 : index
      %c0_21 = arith.constant 0 : index
      %c0_22 = arith.constant 0 : index
      %60 = vector.load %arg4[%c0_20, %c0_21, %c0_22] : memref<1x8x128xf32, #tpu.memory_space<vmem>>, vector<1x8x128xf32>
      %cst_23 = arith.constant 0.000000e+00 : f32
      %61 = vector.broadcast %cst_23 : f32 to vector<16x128xf32>
      %62 = arith.select %59, %44, %61 : vector<16x128xi1>, vector<16x128xf32>
      %63 = vector.shape_cast %62 : vector<16x128xf32> to vector<2x8x128xf32>
      %cst_24 = arith.constant dense<0.000000e+00> : vector<8x128xf32>
      %64 = vector.multi_reduction <add>, %63, %cst_24 [0] : vector<2x8x128xf32> to vector<8x128xf32>
      %65 = vector.shape_cast %64 : vector<8x128xf32> to vector<1x8x128xf32>
      %66 = arith.addf %60, %65 : vector<1x8x128xf32>
      %c0_25 = arith.constant 0 : index
      %c0_26 = arith.constant 0 : index
      %c0_27 = arith.constant 0 : index
      %67 = vector.load %arg4[%c0_25, %c0_26, %c0_27] : memref<1x8x128xf32, #tpu.memory_space<vmem>>, vector<1x8x128xf32>
      tpu.vector_store %arg4[%c0_25, %c0_26, %c0_27], %66 {strides = array<i32>} : memref<1x8x128xf32, #tpu.memory_space<vmem>>, vector<1x8x128xf32>,
    } else {
    }
    return
  }
  func.func @transform_0(%arg0: i32, %arg1: i32) -> (i32, i32) {
    %c1_i32 = arith.constant 1 : i32
    %0 = arith.muli %arg0, %c1_i32 : i32
    %1 = arith.addi %0, %arg1 : i32
    %c0_i32 = arith.constant 0 : i32
    %2 = arith.minsi %1, %c0_i32 : i32
    %c0_i32_0 = arith.constant 0 : i32
    %c0_i32_1 = arith.constant 0 : i32
    return %2, %c0_i32_0 : i32, i32
  }
  func.func @transform_1(%arg0: i32, %arg1: i32) -> (i32, i32) {
    %c1_i32 = arith.constant 1 : i32
    %0 = arith.muli %arg0, %c1_i32 : i32
    %1 = arith.addi %0, %arg1 : i32
    %c0_i32 = arith.constant 0 : i32
    %2 = arith.minsi %1, %c0_i32 : i32
    %c0_i32_0 = arith.constant 0 : i32
    %c0_i32_1 = arith.constant 0 : i32
    return %2, %c0_i32_0 : i32, i32
  }
  func.func @transform_2(%arg0: i32, %arg1: i32) -> (i32, i32, i32) {
    %c0_i32 = arith.constant 0 : i32
    %c0_i32_0 = arith.constant 0 : i32
    %c0_i32_1 = arith.constant 0 : i32
    return %arg0, %c0_i32, %c0_i32_0 : i32, i32, i32
  }
}

</mosaic_0001>

<bundles_post_ra>
// kernel: focal_loss.1
= control target key start
LH: loop header
LB: loop body
LE: loop exit
PB: predicated region body
PF: predicated region fallthrough
CT: control target
= control target key end

     0   :  { %s258_s0 = inlined_call_operand.vmem [shape: f32[16,128], index: 0, kind: input, shape index: {}]   ;;  %s259_s1 = inlined_call_operand.vmem [shape: f32[16,128], index: 1, kind: input, shape index: {}]   ;;  %s260_s2 = inlined_call_operand.vmem [shape: f32[1,8,128], index: 2, kind: output, shape index: {}]  }
   0x1   :  { %v80_v0 = vld [vmem:[%s258_s0] sm:$0xff]  ;;  %v237_v1 = vld [vmem:[%s258_s0 + $0x8] sm:$0xff] }
   0x2   :  { %v84_v2 = vand.u32 2147483647, %v80_v0  ;;  %v85_v3 = vand.u32 2147483647, %v237_v1  ;;  %vm130_vm0 = vcmp.ge.f32.partialorder %v80_v0, 0.0  ;;  %vm131_vm1 = vcmp.ge.f32.partialorder %v237_v1, 0.0 }
   0x3   :  { %v92_v20 = vmin.f32 %v80_v0, 0.0  ;;  %v93_v25 = vmin.f32 %v237_v1, 0.0  ;;  %v82_v29 = vld [vmem:[%s259_s1] sm:$0xff]  ;;  %v83_v32 = vld [vmem:[%s259_s1 + $0x8] sm:$0xff] }
   0x4   :  { %v86_v4 = vsub.f32 0.0, %v84_v2  ;;  %v87_v5 = vsub.f32 0.0, %v85_v3  ;;  %v122_v34 = vsub.f32 1.0, %v82_v29  ;;  %v140_v39 = vmul.f32 -0.5, %v82_v29 }
   0x5   :  { %v141_v41 = vmul.f32 -0.5, %v83_v32  ;;  %v123_v50 = vsub.f32 1.0, %v83_v32 }
   0x6   :  { %v88_v6 = vmul.f32 1.442695, %v86_v4  ;;  %v90_v7 = vmul.f32 1.442695, %v87_v5  ;;  %v142_v57 = vadd.f32 0.75, %v140_v39 }
   0x7   :  { %v143_v60 = vadd.f32 0.75, %v141_v41 }
   0x8   :  { %204 = vpow2.f32 %v88_v6 }
   0x9   :  { %206 = vpow2.f32 %v90_v7 }
  0x12   :  { %v205_v8 = vpop.eup %204 }
  0x13   :  { %v207_v9 = vpop.eup %206  ;;  %v94_v10 = vadd.f32 1.0, %v205_v8  ;;  %v97_v12 = vmul.f32 -0.5, %v205_v8  ;;  %v100_v15 = vand.u32 2147483647, %v205_v8  ;;  %v132_v23 = vsel %vm130_vm0, 1.0, %v205_v8 }
  0x14   :  { %v103_v11 = vadd.f32 1.0, %v207_v9  ;;  %v106_v13 = vmul.f32 -0.5, %v207_v9  ;;  %v109_v17 = vand.u32 2147483647, %v207_v9  ;;  %v133_v27 = vsel %vm131_vm1, 1.0, %v207_v9 }
  0x15   :  { %208 = vlog2.f32 %v94_v10  ;;  %v98_v14 = vadd.f32 1.0, %v97_v12  ;;  %vm241_vm2 = vcmp.lt.f32.partialorder %v100_v15, 0.0004427343 }
  0x16   :  { %210 = vlog2.f32 %v103_v11  ;;  %v107_v16 = vadd.f32 1.0, %v106_v13  ;;  %vm110_vm3 = vcmp.lt.f32.partialorder %v109_v17, 0.0004427343 }
  0x17   :  { %212 = vrcp.f32 %v94_v10  ;;  %v99_v18 = vmul.f32 %v205_v8, %v98_v14 }
  0x18   :  { %214 = vrcp.f32 %v103_v11  ;;  %v108_v22 = vmul.f32 %v207_v9, %v107_v16 }
  0x1f   :  { %v209_v19 = vpop.eup %208 }
  0x20   :  { %v211_v24 = vpop.eup %210  ;;  %v96_v26 = vmul.f32 0.6931472, %v209_v19 }
  0x21   :  { %v213_v28 = vpop.eup %212  ;;  %v105_v30 = vmul.f32 0.6931472, %v211_v24 }
  0x22   :  { %v215_v31 = vpop.eup %214  ;;  %v102_v33 = vsel %vm241_vm2, %v99_v18, %v96_v26  ;;  %v138_v35 = vmul.f32 %v213_v28, %v132_v23 }
  0x23   :  { %v111_v36 = vsel %vm110_vm3, %v108_v22, %v105_v30  ;;  %v112_v37 = vsub.f32 %v92_v20, %v102_v33  ;;  %v139_v38 = vmul.f32 %v215_v31, %v133_v27 }
  0x24   :  { %v113_v40 = vsub.f32 %v93_v25, %v111_v36  ;;  %v144_v42 = vadd.f32 %v138_v35, %v82_v29  ;;  %v146_v43 = vmul.f32 %v138_v35, %v82_v29 }
  0x25   :  { %v114_v44 = vsub.f32 %v112_v37, %v80_v0  ;;  %v116_v45 = vmax.f32 %v112_v37, -100.0  ;;  %v145_v46 = vadd.f32 %v139_v38, %v83_v32  ;;  %v147_v47 = vmul.f32 %v139_v38, %v83_v32 }
  0x26   :  { %v115_v48 = vsub.f32 %v113_v40, %v237_v1  ;;  %v117_v49 = vmax.f32 %v113_v40, -100.0  ;;  %v148_v51 = vmul.f32 2.0, %v146_v43 }
  0x27   :  { %v118_v52 = vmax.f32 %v114_v44, -100.0  ;;  %v120_v53 = vmul.f32 %v116_v45, %v82_v29  ;;  %v149_v54 = vmul.f32 2.0, %v147_v47 }
  0x28   :  { %v119_v55 = vmax.f32 %v115_v48, -100.0  ;;  %v121_v56 = vmul.f32 %v117_v49, %v83_v32  ;;  %v150_v58 = vsub.f32 %v144_v42, %v148_v51 }
  0x29   :  { %v124_v59 = vmul.f32 %v122_v34, %v118_v52  ;;  %v151_v61 = vsub.f32 %v145_v46, %v149_v54 }
  0x2a   :  { %v125_v62 = vmul.f32 %v123_v50, %v119_v55  ;;  %v152_v63 = vmul.f32 %v150_v58, %v150_v58 }
  0x2b   :  { %v126_v0 = vadd.f32 %v124_v59, %v120_v53  ;;  %v153_v2 = vmul.f32 %v151_v61, %v151_v61 }
  0x2c   :  { %v127_v3 = vadd.f32 %v125_v62, %v121_v56  ;;  %v154_v4 = vmul.f32 %v152_v63, %v142_v57 }
  0x2d   :  { %v128_v1 = vsub.f32 0.0, %v126_v0  ;;  %v155_v5 = vmul.f32 %v153_v2, %v143_v60 }
  0x2e   :  { %v129_v6 = vsub.f32 0.0, %v127_v3 }
  0x2f   :  { %v156_v7 = vmul.f32 %v154_v4, %v128_v1 }
  0x30   :  { %v157_v8 = vmul.f32 %v155_v5, %v129_v6 }
  0x32   :  { %v167_v9 = vadd.f32 %v157_v8, %v156_v7 }
  0x34   :  { %169 = vst [vmem:[%s260_s2] sm:$0xff] %v167_v9 }

</bundles_post_ra>
